<compile_context>
chip_gen: v7x
topology: tpu7x:2x2x1
jax: 0.10.0
libtpu: 0.0.40
codegen_flags: <defaults>
</compile_context>

<pallas_src>
import jax
import jax.numpy as jnp
from jax.experimental import pallas as pl
from jax.experimental.pallas import tpu as pltpu


def mlp_kernel(x_ref, w_ref, b_ref, o_ref):
    # x_ref: (TB, P*in) VMEM, streamed per grid step (lane-packed rows)
    # w_ref: (P*in, P)  VMEM, resident block-diagonal folded weight
    # b_ref: (1, 1)     SMEM, scalar folded bias
    acc = jnp.dot(x_ref[...], w_ref[...], preferred_element_type=jnp.float32)
    acc = acc + b_ref[0, 0]
    # ReLU only on the final layer output, matching the reference forward.
    o_ref[...] = jnp.maximum(acc, 0.0).astype(o_ref.dtype)


def mlp_forward(x, params, *, block_b=65536):
    """x: (B, input_size); params: dict of (in,out) weights & (1,out) biases."""
    B, in_features = x.shape

    # Fold the 4 affine layers into one (exact: no inter-layer nonlinearity).
    w = params["w0"] @ params["w1"] @ params["w2"] @ params["w3"]        # (in, 1)
    b = (((params["b0"] @ params["w1"] + params["b1"]) @ params["w2"]
          + params["b2"]) @ params["w3"] + params["b3"])                 # (1, 1)

    # Lane packing factor: P original rows per 128-lane packed row.
    if in_features <= 128 and 128 % in_features == 0:
        P = 128 // in_features
    else:
        P = 1  # TODO(synk): for in_features not dividing 128, pad K to 128 instead.

    # Pad batch to a multiple of P with zero rows (sliced off after the call).
    Bp = ((B + P - 1) // P) * P
    if Bp != B:
        x = jnp.pad(x, ((0, Bp - B), (0, 0)))
    packed_rows = Bp // P
    xp = x.reshape(packed_rows, P * in_features)        # row-major, free

    # Block-diagonal packed weight: column j holds W_comb in rows
    # [j*in, (j+1)*in), zeros elsewhere -> padded lanes contribute nothing.
    wp = jnp.kron(jnp.eye(P, dtype=w.dtype), w).astype(x.dtype)   # (P*in, P)
    b = b.astype(jnp.float32).reshape(1, 1)

    # Packed-row tile: big (multi-MiB) blocks to amortize per-step overhead.
    tb = min(max(block_b // P, 1), packed_rows)
    if tb < packed_rows:
        tb = max(8, (tb // 8) * 8)                      # (8,128) tiling constraint
    grid = (pl.cdiv(packed_rows, tb),)

    itemsize = jnp.dtype(x.dtype).itemsize
    cost = pl.CostEstimate(
        flops=2 * packed_rows * (P * in_features) * P,
        transcendentals=0,
        bytes_accessed=(packed_rows * P * in_features * itemsize     # x stream
                        + packed_rows * P * itemsize                 # output
                        + P * in_features * P * itemsize),           # weight
    )

    out_p = pl.pallas_call(
        mlp_kernel,
        out_shape=jax.ShapeDtypeStruct((packed_rows, P), x.dtype),
        grid_spec=pltpu.PrefetchScalarGridSpec(
            num_scalar_prefetch=0,
            grid=grid,
            in_specs=[
                # packed x: streamed over the batch grid (auto double-buffered).
                pl.BlockSpec((tb, P * in_features), lambda i: (i, 0)),
                # block-diagonal folded weight: same block every step -> resident.
                pl.BlockSpec((P * in_features, P), lambda i: (0, 0)),
                # folded bias scalar lives in SMEM.
                pl.BlockSpec(memory_space=pltpu.MemorySpace.SMEM),
            ],
            out_specs=pl.BlockSpec((tb, P), lambda i: (i, 0)),
        ),
        compiler_params=pltpu.CompilerParams(
            # Batch blocks are independent -> shard across v7x's 2 TensorCores.
            dimension_semantics=("parallel",),
            # Headroom for the 8 MiB (x2 double-buffer) default x block and for
            # larger sweeps on v5e/v6e; stays under v7x's 64 MiB physical VMEM.
            vmem_limit_bytes=48 << 20,
        ),
        cost_estimate=cost,
    )(xp, wp, b)

    out = out_p.reshape(Bp, 1)
    if Bp != B:
        out = out[:B]
    return out


def init_params(key, input_size):
    """Deterministic init mimicking nn.Linear's U(-1/sqrt(fan_in), 1/sqrt(fan_in)).

    Weights are stored transposed vs torch.nn.Linear: (in_features, out_features).
    """
    dims = [(input_size, 64), (64, 32), (32, 16), (16, 1)]
    params = {}
    keys = jax.random.split(key, 2 * len(dims))
    for i, (fan_in, fan_out) in enumerate(dims):
        bound = 1.0 / jnp.sqrt(fan_in)
        params[f"w{i}"] = jax.random.uniform(
            keys[2 * i], (fan_in, fan_out), jnp.float32, -bound, bound)
        params[f"b{i}"] = jax.random.uniform(
            keys[2 * i + 1], (1, fan_out), jnp.float32, -bound, bound)
    return params


def mlp_reference(x, params):
    h = x @ params["w0"] + params["b0"]
    h = h @ params["w1"] + params["b1"]
    h = h @ params["w2"] + params["b2"]
    h = h @ params["w3"] + params["b3"]
    return jnp.maximum(h, 0.0)


if __name__ == "__main__":
    key = jax.random.PRNGKey(0)
    k_param, k_x, k_x2, k_p3, k_x3 = jax.random.split(key, 5)

    input_size = 32
    params = init_params(k_param, input_size)

    # Small shape consistent with the module (single grid block, packed (2,128)).
    batch = 8
    x = jax.random.normal(k_x, (batch, input_size), jnp.float32)
    out = jax.block_until_ready(mlp_forward(x, params))
    ref = mlp_reference(x, params)
    assert out.shape == (batch, 1), out.shape
    assert jnp.allclose(out, ref, atol=1e-4, rtol=1e-4), (
        f"max abs diff {jnp.max(jnp.abs(out - ref))}")

    # Multi-block pipelined grid + batch not a multiple of the pack factor
    # (pads to 1004 rows -> 251 packed rows, tb=128 -> partial trailing block).
    batch2 = 1003
    x2 = jax.random.normal(k_x2, (batch2, input_size), jnp.float32)
    out2 = jax.block_until_ready(mlp_forward(x2, params, block_b=512))
    ref2 = mlp_reference(x2, params)
    assert out2.shape == (batch2, 1), out2.shape
    assert jnp.allclose(out2, ref2, atol=1e-4, rtol=1e-4), (
        f"max abs diff {jnp.max(jnp.abs(out2 - ref2))}")

    # Exercise the no-packing fallback path (input_size does not divide 128).
    input_size3 = 48
    params3 = init_params(k_p3, input_size3)
    x3 = jax.random.normal(k_x3, (16, input_size3), jnp.float32)
    out3 = jax.block_until_ready(mlp_forward(x3, params3))
    ref3 = mlp_reference(x3, params3)
    assert out3.shape == (16, 1), out3.shape
    assert jnp.allclose(out3, ref3, atol=1e-4, rtol=1e-4), (
        f"max abs diff {jnp.max(jnp.abs(out3 - ref3))}")

    print("KERNEL_OK")
</pallas_src>

<mosaic_0001>
module attributes {stable_mosaic.version = 11 : i64} {
  func.func @mlp_kernel(%arg0: i32, %arg1: memref<2x128xf32, #tpu.memory_space<vmem>>, %arg2: memref<128x4xf32, #tpu.memory_space<vmem>>, %arg3: memref<1x1xf32, #tpu.memory_space<smem>>, %arg4: memref<2x4xf32, #tpu.memory_space<vmem>>) attributes {dimension_semantics = [#tpu.dimension_semantics<parallel>], iteration_bounds = array<i64: 1>, scalar_prefetch = 0 : i64, scratch_operands = 0 : i64, tpu.core_type = #tpu.core_type<tc>, window_params = [{transform_indices = @transform_0, window_bounds = array<i64: 2, 128>}, {pipeline_mode = #tpu.pipeline_mode<synchronous>, transform_indices = @transform_1, window_bounds = array<i64: 128, 4>}, {transform_indices = @transform_2, window_bounds = array<i64: 1, 1>}, {transform_indices = @transform_3, window_bounds = array<i64: 2, 4>}]} {
    %c0 = arith.constant 0 : index
    %c0_0 = arith.constant 0 : index
    %0 = vector.load %arg1[%c0, %c0_0] : memref<2x128xf32, #tpu.memory_space<vmem>>, vector<2x128xf32>
    %c0_1 = arith.constant 0 : index
    %c0_2 = arith.constant 0 : index
    %1 = vector.load %arg2[%c0_1, %c0_2] : memref<128x4xf32, #tpu.memory_space<vmem>>, vector<128x4xf32>
    %cst = arith.constant dense<0.000000e+00> : vector<2x4xf32>
    %2 = tpu.matmul %0, %1, %cst {dimension_numbers = #tpu.dot_dimension_numbers<[1], [0], [0], [1], [0, 0, 1, 1], [], []>} : vector<2x128xf32>, vector<128x4xf32>, vector<2x4xf32> -> vector<2x4xf32>
    %c0_3 = arith.constant 0 : index
    %c0_4 = arith.constant 0 : index
    %3 = memref.load %arg3[%c0_3, %c0_4] : memref<1x1xf32, #tpu.memory_space<smem>>
    %4 = vector.broadcast %3 : f32 to vector<2x4xf32>
    %5 = arith.addf %2, %4 : vector<2x4xf32>
    %cst_5 = arith.constant 0.000000e+00 : f32
    %6 = vector.broadcast %cst_5 : f32 to vector<2x4xf32>
    %7 = arith.maximumf %5, %6 : vector<2x4xf32>
    %c0_6 = arith.constant 0 : index
    %c0_7 = arith.constant 0 : index
    %8 = vector.load %arg4[%c0_6, %c0_7] : memref<2x4xf32, #tpu.memory_space<vmem>>, vector<2x4xf32>
    tpu.vector_store %arg4[%c0_6, %c0_7], %7 {strides = array<i32>} : memref<2x4xf32, #tpu.memory_space<vmem>>, vector<2x4xf32>,
    return
  }
  func.func @transform_0(%arg0: i32) -> (i32, i32) {
    %c0_i32 = arith.constant 0 : i32
    %c0_i32_0 = arith.constant 0 : i32
    return %arg0, %c0_i32 : i32, i32
  }
  func.func @transform_1(%arg0: i32) -> (i32, i32) {
    %c0_i32 = arith.constant 0 : i32
    %c0_i32_0 = arith.constant 0 : i32
    %c0_i32_1 = arith.constant 0 : i32
    return %c0_i32, %c0_i32_0 : i32, i32
  }
  func.func @transform_2(%arg0: i32) -> (i32, i32) {
    %c0_i32 = arith.constant 0 : i32
    %c0_i32_0 = arith.constant 0 : i32
    %c0_i32_1 = arith.constant 0 : i32
    return %c0_i32, %c0_i32_0 : i32, i32
  }
  func.func @transform_3(%arg0: i32) -> (i32, i32) {
    %c0_i32 = arith.constant 0 : i32
    %c0_i32_0 = arith.constant 0 : i32
    return %arg0, %c0_i32 : i32, i32
  }
}

</mosaic_0001>

<bundles_post_ra>
// kernel: tpu_custom_call.1
= control target key start
LH: loop header
LB: loop body
LE: loop exit
PB: predicated region body
PF: predicated region fallthrough
CT: control target
= control target key end

     0   :  { %v226_v3 = vmov 0.0|0.0   ;;  %vm227_vm0 = vmmov 0   ;;  %v228_v6 = vmov 0.0   ;;  %s316_s0 = inlined_call_operand.vmem [shape: f32[2,128], index: 0, kind: input, shape index: {}]   ;;  %s317_s1 = inlined_call_operand.vmem [shape: f32[128,4], index: 1, kind: input, shape index: {}]   ;;  %s318_s2 = inlined_call_operand.<no memory space> [shape: f32[1,1], index: 2, kind: input, shape index: {}]   ;;  %s319_s3 = inlined_call_operand.hbm [shape: f32[2,4], index: 3, kind: output, shape index: {}]  }
   0x1   :  { %v17_v0 = vld [vmem:[%s317_s1] sm:$0xff]  ;;  %v18_v1 = vld [vmem:[%s317_s1 + $0x8] sm:$0xff]  ;;  %v19_v2 = vld [vmem:[%s317_s1 + $0x10] sm:$0xff]  ;;  %174 = vmatprep.subr.bf16.mxu0 %v226_v3  ;;  %171 = vmatprep.mubr.msk.f32.mxu0 %vm227_vm0, %v228_v6 }
   0x2   :  { %v175_v4 = vpack.c.bf16 %v18_v1, %v17_v0  ;;  %v20_v5 = vld [vmem:[%s317_s1 + $0x18] sm:$0xff]  ;;  %v21_v8 = vld [vmem:[%s317_s1 + $0x20] sm:$0xff]  ;;  %v22_v9 = vld [vmem:[%s317_s1 + $0x28] sm:$0xff] }
   0x3   :  { %v178_v7 = vpack.c.bf16 %v20_v5, %v19_v2 }
   0x4   :  { %176 = vmatpush3.bf16.msra.mxu0 %v175_v4 }
   0x5   :  { %177 = vmatprep.subr.bf16.mxu0 %v226_v3 }
   0x6   :  { %9 = vsyncpa [#allocation4], 0  ;;  %v181_v10 = vpack.c.bf16 %v22_v9, %v21_v8  ;;  %v23_v11 = vld [vmem:[%s317_s1 + $0x30] sm:$0xff]  ;;  %v24_v12 = vld [vmem:[%s317_s1 + $0x38] sm:$0xff]  ;;  %v34_v27 = vstv %s318_s2  ;;  %s229_s21 = smov [#allocation3]   ;;  %vm106_vm1 = vcmask 25600  }
   0x7   :  { %v184_v13 = vpack.c.bf16 %v24_v12, %v23_v11  ;;  %v25_v14 = vld [vmem:[%s317_s1 + $0x40] sm:$0xff]  ;;  %v26_v15 = vld [vmem:[%s317_s1 + $0x48] sm:$0xff]  ;;  %v27_v17 = vld [vmem:[%s317_s1 + $0x50] sm:$0xff]  ;;  %s114_s22 = sshll.u32 %s229_s21, 4  ;;  %s115_s22 = int_to_ptr.vmem [resolvable:$true] %s114_s22 }
   0x8   :  { %179 = vmatpush3.bf16.msra.mxu0 %v178_v7  ;;  %v187_v16 = vpack.c.bf16 %v26_v15, %v25_v14  ;;  %v28_v18 = vld [vmem:[%s317_s1 + $0x58] sm:$0xff]  ;;  %v29_v20 = vld [vmem:[%s317_s1 + $0x60] sm:$0xff]  ;;  %v30_v21 = vld [vmem:[%s317_s1 + $0x68] sm:$0xff]  ;;  %p207_p1 = scmp.lt.s32.totalorder %s115_s22, %s115_s22 }
   0x9   :  { %180 = vmatprep.subr.bf16.mxu0 %v226_v3  ;;  %v190_v19 = vpack.c.bf16 %v28_v18, %v27_v17  ;;  %v193_v22 = vpack.c.bf16 %v30_v21, %v29_v20  ;;  %v31_v23 = vld [vmem:[%s317_s1 + $0x70] sm:$0xff]  ;;  %v32_v24 = vld [vmem:[%s317_s1 + $0x78] sm:$0xff]  ;;  %v16_v26 = vld [vmem:[%s316_s0] sm:$0x3]  ;;  %s202_s1 = scalar_lea.vmem %s115_s22, 32 }
   0xa   :  { %v196_v25 = vpack.c.bf16 %v32_v24, %v31_v23  ;;  %p203_p0 = scmp.ne.s32.totalorder %s115_s22, %s202_s1  ;;  %p208_p2 = scmp.lt.s32.totalorder %s202_s1, %s202_s1 }
   0xc   :  { %182 = vmatpush3.bf16.msra.mxu0 %v181_v10  ;;  %p209_p3 = por %p208_p2, %p207_p1 }
   0xd   :  { %183 = vmatprep.subr.bf16.mxu0 %v226_v3 }
   0xe   :  { %p210_p4 = pnand %p209_p3, %p203_p0 }
  0x10   :  { %185 = vmatpush3.bf16.msra.mxu0 %v184_v13 }
  0x11   :  { %186 = vmatprep.subr.bf16.mxu0 %v226_v3 }
  0x14   :  { %188 = vmatpush3.bf16.msra.mxu0 %v187_v16 }
  0x15   :  { %189 = vmatprep.subr.bf16.mxu0 %v226_v3 }
  0x18   :  { %191 = vmatpush3.bf16.msra.mxu0 %v190_v19 }
  0x19   :  { %192 = vmatprep.subr.bf16.mxu0 %v226_v3 }
  0x1c   :  { %194 = vmatpush3.bf16.msra.mxu0 %v193_v22 }
  0x1d   :  { %195 = vmatprep.subr.bf16.mxu0 %v226_v3 }
  0x20   :  { %197 = vmatpush3.bf16.msra.mxu0 %v196_v25 }
  0x23   :  { %172 = vmatmul.mubr.f32.vlgmr.msra.gmra.mrb[0].mxu0 %v16_v26 }
  0xf6   :  { %v101_v28 = vpop.f32.mrb[0].mxu0 }
  0xf7   :  { %v102_v29 = vadd.f32 %v101_v28, %v34_v27  ;;  %v173_v30 = vpop.f32.mrb[1].mxu0 }
  0xf9   :  { %v105_v31 = vmax.f32 %v102_v29, 0.0 }
  0xfb   :  { %107 = vst.msk [vmem:[#allocation3] sm:$0x3] %vm106_vm1, %v105_v31 }
  0xfc   :  { %213 = shalt.err (!%p210_p4)
}
  0xfd   :  { %s214_s2 = scalar_lea.hbm %s319_s3, 32 }
  0xfe   :  { %p215_p5 = scmp.ne.s32.totalorder %s319_s3, %s214_s2  ;;  %p218_p6 = scmp.lt.u32.totalorder %s214_s2, %s319_s3 }
 0x100   :  { %p220_p7 = pnand %p218_p6, %p215_p5 }
 0x102   :  { %223 = shalt.err (!%p220_p7)
}
 0x103   :  { %117 = dma.vmem_to_hbm [thread:$0]  %s115_s22, 32, %s319_s3, [#allocation4]  }
 0x104   :  { %224 = dma.done.wait [#allocation4], 32  }
 0x105   :  { %225 = vsyncadd [#allocation4], 4294967264 }
 0x106   :  { %121 = vsyncpa [#allocation4], 1 }

</bundles_post_ra>
